<compile_context>
chip_gen: v7x
topology: tpu7x:2x2x1
jax: 0.10.0
libtpu: 0.0.40
codegen_flags: <defaults>
</compile_context>

<pallas_src>
import jax
import jax.numpy as jnp
from jax.experimental import pallas as pl
from jax.experimental.pallas import tpu as pltpu


def _wavelet_res_kernel(body_ref, halo_ref, w3t_ref, b3_ref, w1t_ref, b1_ref,
                        o_ref):
    # body_ref: (1, Cin, TR, Wp)   non-overlapping TR-row window of padded x
    # halo_ref: (1, Cin, 8, Wp)    the 8 padded rows just below the body
    # w3t_ref:  (Hid, 9*Cin)       3x3 conv weights, (tap, cin) on K
    # b3_ref:   (Hid, 1)
    # w1t_ref:  (Cout, Hid)        1x1 conv weights (transposed)
    # b1_ref:   (Cout, 1)
    # o_ref:    (1, Cout, TR, W)
    _, cin, tr, wp = body_ref.shape
    w = wp - 2
    cout = o_ref.shape[1]
    n = tr * wp                      # flattened spatial incl. 2 junk cols/row

    # Assemble the halo'd chunk in VMEM and flatten spatial onto the lane axis.
    chunk = jnp.concatenate([body_ref[0], halo_ref[0, :, 0:3, :]], axis=1)
    flat = chunk.reshape(cin, (tr + 3) * wp)                    # (Cin, L)

    # 9 conv taps = 9 static lane windows of the flat chunk, stacked into one
    # (9*Cin, n) slab -> a single K=9*Cin MXU matmul (no per-tap VPU adds).
    taps = jnp.concatenate(
        [flat[:, dy * wp + dx: dy * wp + dx + n]
         for dy in range(3) for dx in range(3)], axis=0)        # (9*Cin, n)

    hid = jnp.dot(w3t_ref[...], taps, preferred_element_type=jnp.float32)
    hid = jnp.maximum(hid + b3_ref[...], 0.0)                   # bias + ReLU
    out = jnp.dot(w1t_ref[...], hid, preferred_element_type=jnp.float32)
    out = out + b1_ref[...] + flat[:, wp + 1: wp + 1 + n]       # bias + resid

    # Drop the 2 junk columns per row; store channel-major (NCHW-native).
    o_ref[...] = out.reshape(1, cout, tr, wp)[:, :, :, :w].astype(o_ref.dtype)


def _cdiv(a, b):
    return -(-a // b)


def _vmem_limit_bytes():
    # ~3/4 of physical VMEM: ~96 MiB on v5e/v6e (128 MiB), ~48 MiB on v7x (64).
    try:
        phys = int(pltpu.get_tpu_info().vmem_capacity_bytes)
    except Exception:
        phys = 64 * 1024 * 1024
    return min((phys * 3) // 4, 100 * 1024 * 1024)


def _pick_rows_per_chunk(H, W, Cin, Hid, Cout, vmem_budget):
    """Largest multiple-of-8 row count per grid step that fits the budget."""
    wp = W + 2

    def vmem_bytes(t):
        n = t * wp
        io = 2 * (Cin * t * wp + Cin * 8 * wp + Cout * t * W) * 4   # dbl-buf
        work = (2 * Cin * (t + 3) * wp          # chunk + flat
                + 9 * Cin * n                   # tap slab
                + Hid * n                       # hidden
                + 2 * Cout * n) * 4             # out + store relayout
        wts = 2 * (9 * Cin * Hid + Hid + Hid * Cout + Cout) * 4
        return io + work + wts

    t = _cdiv(H, 8) * 8                         # whole image if it fits
    while t > 8 and vmem_bytes(t) > vmem_budget:
        t -= 8
    return max(8, t)


def wavelet_res(x, w3, b3, w1, b1):
    """WaveletRes forward: conv1x1(relu(conv3x3(x))) + x.  NCHW in / NCHW out.

    x:  (B, Cin, H, W) float32
    w3: (3, 3, Cin, Hid) HWIO   b3: (Hid,)
    w1: (Hid, Cout)             b1: (Cout,)   (requires Cout == Cin)
    """
    B, Cin, H, W = x.shape
    Hid = w3.shape[-1]
    Cout = w1.shape[-1]
    assert Cout == Cin, "residual add requires out_c == in_c"

    vmem_limit = _vmem_limit_bytes()
    tr = _pick_rows_per_chunk(H, W, Cin, Hid, Cout, (vmem_limit * 4) // 5)
    nc = _cdiv(H, tr)
    # Nudge tiny odd grids to an even size so both v7x TensorCores get work.
    if (B * nc) % 2 == 1 and B * nc < 8:
        t2 = tr
        while t2 > 8 and (B * _cdiv(H, t2)) % 2 == 1:
            t2 -= 8
        if (B * _cdiv(H, t2)) % 2 == 0:
            tr = t2
            nc = _cdiv(H, tr)
    tr8 = tr // 8
    Hc = nc * tr                        # H rounded up to a multiple of tr
    Wp = W + 2
    Hp = Hc + 8                         # room for the trailing 8-row halo blk

    # Only activation copy: spatial zero-pad (1 top row, 1 col each side,
    # bottom rows so every body/halo block stays in range).
    x_pad = jnp.pad(x, ((0, 0), (0, 0), (1, Hp - 1 - H), (1, 1)))

    # Weight layouts for the transposed (channel-major) matmuls.
    w3t = jnp.transpose(w3, (3, 0, 1, 2)).reshape(Hid, 9 * Cin)   # (Hid, 9Cin)
    b3c = b3.reshape(Hid, 1)
    w1t = jnp.transpose(w1, (1, 0))                               # (Cout, Hid)
    b1c = b1.reshape(Cout, 1)

    out = pl.pallas_call(
        _wavelet_res_kernel,
        out_shape=jax.ShapeDtypeStruct((B, Cout, Hc, W), x.dtype),
        grid_spec=pltpu.PrefetchScalarGridSpec(
            num_scalar_prefetch=0,
            grid=(B, nc),
            in_specs=[
                # tr-row body window (non-overlapping, auto-pipelined)
                pl.BlockSpec((1, Cin, tr, Wp), lambda b, c: (b, 0, c, 0)),
                # the 8 padded rows just below it (first 2 form the halo)
                pl.BlockSpec((1, Cin, 8, Wp),
                             lambda b, c: (b, 0, (c + 1) * tr8, 0)),
                pl.BlockSpec((Hid, 9 * Cin), lambda b, c: (0, 0)),
                pl.BlockSpec((Hid, 1), lambda b, c: (0, 0)),
                pl.BlockSpec((Cout, Hid), lambda b, c: (0, 0)),
                pl.BlockSpec((Cout, 1), lambda b, c: (0, 0)),
            ],
            out_specs=pl.BlockSpec((1, Cout, tr, W), lambda b, c: (b, 0, c, 0)),
        ),
        compiler_params=pltpu.CompilerParams(
            dimension_semantics=("parallel", "parallel"),
            vmem_limit_bytes=vmem_limit,
        ),
    )(x_pad, x_pad, w3t, b3c, w1t, b1c)

    if Hc != H:
        out = out[:, :, :H, :]          # drop rows from chunk rounding
    return out


if __name__ == "__main__":
    key = jax.random.PRNGKey(0)
    B, Cin, H, W = 2, 4, 16, 16
    Hid, Cout = 32, 4                   # out_c must equal in_c (residual add)

    k1, k2, k3, k4, k5 = jax.random.split(key, 5)
    x = jax.random.normal(k1, (B, Cin, H, W), dtype=jnp.float32)

    # Deterministic, PyTorch-default-style uniform init (bounds 1/sqrt(fan_in)).
    bound3 = 1.0 / float((Cin * 3 * 3) ** 0.5)
    w3 = jax.random.uniform(k2, (3, 3, Cin, Hid), jnp.float32, -bound3, bound3)
    b3 = jax.random.uniform(k3, (Hid,), jnp.float32, -bound3, bound3)
    bound1 = 1.0 / float(Hid ** 0.5)
    w1 = jax.random.uniform(k4, (Hid, Cout), jnp.float32, -bound1, bound1)
    b1 = jax.random.uniform(k5, (Cout,), jnp.float32, -bound1, bound1)

    y = wavelet_res(x, w3, b3, w1, b1)
    y = jax.block_until_ready(y)

    # Pure-JAX reference (same math as the PyTorch module), NCHW end to end.
    h = jax.lax.conv_general_dilated(
        x, w3, window_strides=(1, 1), padding=((1, 1), (1, 1)),
        dimension_numbers=("NCHW", "HWIO", "NCHW")) + b3.reshape(1, Hid, 1, 1)
    h = jnp.maximum(h, 0.0)
    ref = jnp.einsum("bchw,cd->bdhw", h, w1) + b1.reshape(1, Cout, 1, 1) + x

    err = float(jnp.max(jnp.abs(y - ref)))
    assert jnp.allclose(y, ref, atol=1e-4, rtol=1e-4), f"max abs err = {err}"
    print("KERNEL_OK")
</pallas_src>

<mosaic_0001>
module attributes {stable_mosaic.version = 11 : i64} {
  func.func @_wavelet_res_kernel(%arg0: i32, %arg1: i32, %arg2: memref<1x4x16x18xf32, #tpu.memory_space<vmem>>, %arg3: memref<1x4x8x18xf32, #tpu.memory_space<vmem>>, %arg4: memref<32x36xf32, #tpu.memory_space<vmem>>, %arg5: memref<32x1xf32, #tpu.memory_space<vmem>>, %arg6: memref<4x32xf32, #tpu.memory_space<vmem>>, %arg7: memref<4x1xf32, #tpu.memory_space<vmem>>, %arg8: memref<1x4x16x16xf32, #tpu.memory_space<vmem>>) attributes {dimension_semantics = [#tpu.dimension_semantics<parallel>, #tpu.dimension_semantics<parallel>], iteration_bounds = array<i64: 2, 1>, scalar_prefetch = 0 : i64, scratch_operands = 0 : i64, tpu.core_type = #tpu.core_type<tc>, window_params = [{transform_indices = @transform_0, window_bounds = array<i64: 1, 4, 16, 18>}, {transform_indices = @transform_1, window_bounds = array<i64: 1, 4, 8, 18>}, {pipeline_mode = #tpu.pipeline_mode<synchronous>, transform_indices = @transform_2, window_bounds = array<i64: 32, 36>}, {pipeline_mode = #tpu.pipeline_mode<synchronous>, transform_indices = @transform_3, window_bounds = array<i64: 32, 1>}, {pipeline_mode = #tpu.pipeline_mode<synchronous>, transform_indices = @transform_4, window_bounds = array<i64: 4, 32>}, {pipeline_mode = #tpu.pipeline_mode<synchronous>, transform_indices = @transform_5, window_bounds = array<i64: 4, 1>}, {transform_indices = @transform_6, window_bounds = array<i64: 1, 4, 16, 16>}]} {
    %c0 = arith.constant 0 : index
    %c0_0 = arith.constant 0 : index
    %c0_1 = arith.constant 0 : index
    %c0_2 = arith.constant 0 : index
    %0 = vector.load %arg2[%c0, %c0_0, %c0_1, %c0_2] : memref<1x4x16x18xf32, #tpu.memory_space<vmem>>, vector<1x4x16x18xf32>
    %1 = vector.shape_cast %0 : vector<1x4x16x18xf32> to vector<4x16x18xf32>
    %c0_3 = arith.constant 0 : index
    %c0_4 = arith.constant 0 : index
    %c0_5 = arith.constant 0 : index
    %c0_6 = arith.constant 0 : index
    %2 = vector.load %arg3[%c0_3, %c0_4, %c0_5, %c0_6] : memref<1x4x8x18xf32, #tpu.memory_space<vmem>>, vector<1x4x3x18xf32>
    %3 = vector.shape_cast %2 : vector<1x4x3x18xf32> to vector<4x3x18xf32>
    %4 = tpu.concatenate %1, %3 in 1 : vector<4x16x18xf32>, vector<4x3x18xf32> -> vector<4x19x18xf32>
    %5 = vector.shape_cast %4 : vector<4x19x18xf32> to vector<4x342xf32>
    %6 = vector.extract_strided_slice %5 {offsets = [0, 0], sizes = [4, 288], strides = [1, 1]} : vector<4x342xf32> to vector<4x288xf32>
    %7 = vector.extract_strided_slice %5 {offsets = [0, 1], sizes = [4, 288], strides = [1, 1]} : vector<4x342xf32> to vector<4x288xf32>
    %8 = vector.extract_strided_slice %5 {offsets = [0, 2], sizes = [4, 288], strides = [1, 1]} : vector<4x342xf32> to vector<4x288xf32>
    %9 = vector.extract_strided_slice %5 {offsets = [0, 18], sizes = [4, 288], strides = [1, 1]} : vector<4x342xf32> to vector<4x288xf32>
    %10 = vector.extract_strided_slice %5 {offsets = [0, 19], sizes = [4, 288], strides = [1, 1]} : vector<4x342xf32> to vector<4x288xf32>
    %11 = vector.extract_strided_slice %5 {offsets = [0, 20], sizes = [4, 288], strides = [1, 1]} : vector<4x342xf32> to vector<4x288xf32>
    %12 = vector.extract_strided_slice %5 {offsets = [0, 36], sizes = [4, 288], strides = [1, 1]} : vector<4x342xf32> to vector<4x288xf32>
    %13 = vector.extract_strided_slice %5 {offsets = [0, 37], sizes = [4, 288], strides = [1, 1]} : vector<4x342xf32> to vector<4x288xf32>
    %14 = vector.extract_strided_slice %5 {offsets = [0, 38], sizes = [4, 288], strides = [1, 1]} : vector<4x342xf32> to vector<4x288xf32>
    %15 = tpu.concatenate %6, %7, %8, %9, %10, %11, %12, %13, %14 in 0 : vector<4x288xf32>, vector<4x288xf32>, vector<4x288xf32>, vector<4x288xf32>, vector<4x288xf32>, vector<4x288xf32>, vector<4x288xf32>, vector<4x288xf32>, vector<4x288xf32> -> vector<36x288xf32>
    %c0_7 = arith.constant 0 : index
    %c0_8 = arith.constant 0 : index
    %16 = vector.load %arg4[%c0_7, %c0_8] : memref<32x36xf32, #tpu.memory_space<vmem>>, vector<32x36xf32>
    %cst = arith.constant dense<0.000000e+00> : vector<32x288xf32>
    %17 = tpu.matmul %16, %15, %cst {dimension_numbers = #tpu.dot_dimension_numbers<[1], [0], [0], [1], [0, 0, 1, 1], [], []>} : vector<32x36xf32>, vector<36x288xf32>, vector<32x288xf32> -> vector<32x288xf32>
    %c0_9 = arith.constant 0 : index
    %c0_10 = arith.constant 0 : index
    %18 = vector.load %arg5[%c0_9, %c0_10] : memref<32x1xf32, #tpu.memory_space<vmem>>, vector<32x1xf32>
    %19 = vector.broadcast %18 : vector<32x1xf32> to vector<32x288xf32>
    %20 = arith.addf %17, %19 : vector<32x288xf32>
    %cst_11 = arith.constant 0.000000e+00 : f32
    %21 = vector.broadcast %cst_11 : f32 to vector<32x288xf32>
    %22 = arith.maximumf %20, %21 : vector<32x288xf32>
    %c0_12 = arith.constant 0 : index
    %c0_13 = arith.constant 0 : index
    %23 = vector.load %arg6[%c0_12, %c0_13] : memref<4x32xf32, #tpu.memory_space<vmem>>, vector<4x32xf32>
    %cst_14 = arith.constant dense<0.000000e+00> : vector<4x288xf32>
    %24 = tpu.matmul %23, %22, %cst_14 {dimension_numbers = #tpu.dot_dimension_numbers<[1], [0], [0], [1], [0, 0, 1, 1], [], []>} : vector<4x32xf32>, vector<32x288xf32>, vector<4x288xf32> -> vector<4x288xf32>
    %c0_15 = arith.constant 0 : index
    %c0_16 = arith.constant 0 : index
    %25 = vector.load %arg7[%c0_15, %c0_16] : memref<4x1xf32, #tpu.memory_space<vmem>>, vector<4x1xf32>
    %26 = vector.broadcast %25 : vector<4x1xf32> to vector<4x288xf32>
    %27 = arith.addf %24, %26 : vector<4x288xf32>
    %28 = vector.extract_strided_slice %5 {offsets = [0, 19], sizes = [4, 288], strides = [1, 1]} : vector<4x342xf32> to vector<4x288xf32>
    %29 = arith.addf %27, %28 : vector<4x288xf32>
    %30 = vector.shape_cast %29 : vector<4x288xf32> to vector<1x4x16x18xf32>
    %31 = vector.extract_strided_slice %30 {offsets = [0, 0, 0, 0], sizes = [1, 4, 16, 16], strides = [1, 1, 1, 1]} : vector<1x4x16x18xf32> to vector<1x4x16x16xf32>
    %c0_17 = arith.constant 0 : index
    %c0_18 = arith.constant 0 : index
    %c0_19 = arith.constant 0 : index
    %c0_20 = arith.constant 0 : index
    %32 = vector.load %arg8[%c0_17, %c0_18, %c0_19, %c0_20] : memref<1x4x16x16xf32, #tpu.memory_space<vmem>>, vector<1x4x16x16xf32>
    tpu.vector_store %arg8[%c0_17, %c0_18, %c0_19, %c0_20], %31 {strides = array<i32>} : memref<1x4x16x16xf32, #tpu.memory_space<vmem>>, vector<1x4x16x16xf32>,
    return
  }
  func.func @transform_0(%arg0: i32, %arg1: i32) -> (i32, i32, i32, i32) {
    %c0_i32 = arith.constant 0 : i32
    %c0_i32_0 = arith.constant 0 : i32
    %c0_i32_1 = arith.constant 0 : i32
    return %arg0, %c0_i32, %arg1, %c0_i32_0 : i32, i32, i32, i32
  }
  func.func @transform_1(%arg0: i32, %arg1: i32) -> (i32, i32, i32, i32) {
    %c1_i32 = arith.constant 1 : i32
    %0 = arith.addi %arg1, %c1_i32 : i32
    %c2_i32 = arith.constant 2 : i32
    %1 = arith.muli %0, %c2_i32 : i32
    %c0_i32 = arith.constant 0 : i32
    %c0_i32_0 = arith.constant 0 : i32
    %c0_i32_1 = arith.constant 0 : i32
    return %arg0, %c0_i32, %1, %c0_i32_0 : i32, i32, i32, i32
  }
  func.func @transform_2(%arg0: i32, %arg1: i32) -> (i32, i32) {
    %c0_i32 = arith.constant 0 : i32
    %c0_i32_0 = arith.constant 0 : i32
    %c0_i32_1 = arith.constant 0 : i32
    return %c0_i32, %c0_i32_0 : i32, i32
  }
  func.func @transform_3(%arg0: i32, %arg1: i32) -> (i32, i32) {
    %c0_i32 = arith.constant 0 : i32
    %c0_i32_0 = arith.constant 0 : i32
    %c0_i32_1 = arith.constant 0 : i32
    return %c0_i32, %c0_i32_0 : i32, i32
  }
  func.func @transform_4(%arg0: i32, %arg1: i32) -> (i32, i32) {
    %c0_i32 = arith.constant 0 : i32
    %c0_i32_0 = arith.constant 0 : i32
    %c0_i32_1 = arith.constant 0 : i32
    return %c0_i32, %c0_i32_0 : i32, i32
  }
  func.func @transform_5(%arg0: i32, %arg1: i32) -> (i32, i32) {
    %c0_i32 = arith.constant 0 : i32
    %c0_i32_0 = arith.constant 0 : i32
    %c0_i32_1 = arith.constant 0 : i32
    return %c0_i32, %c0_i32_0 : i32, i32
  }
  func.func @transform_6(%arg0: i32, %arg1: i32) -> (i32, i32, i32, i32) {
    %c0_i32 = arith.constant 0 : i32
    %c0_i32_0 = arith.constant 0 : i32
    %c0_i32_1 = arith.constant 0 : i32
    return %arg0, %c0_i32, %arg1, %c0_i32_0 : i32, i32, i32, i32
  }
}

</mosaic_0001>

<bundles_post_ra>
// kernel: tpu_custom_call.1
= control target key start
LH: loop header
LB: loop body
LE: loop exit
PB: predicated region body
PF: predicated region fallthrough
CT: control target
= control target key end

     0   :  { %11 = vsyncpa [#allocation5], 0  ;;  %s2473_s0 = inlined_call_operand.vmem [shape: f32[2,4,24,18], index: 0, kind: input, shape index: {}]   ;;  %s2474_s1 = inlined_call_operand.vmem [shape: f32[2,4,24,18], index: 1, kind: input, shape index: {}]   ;;  %s2475_s2 = inlined_call_operand.vmem [shape: f32[32,36], index: 2, kind: input, shape index: {}]   ;;  %s2476_s3 = inlined_call_operand.vmem [shape: f32[32,1], index: 3, kind: input, shape index: {}]   ;;  %s2477_s4 = inlined_call_operand.vmem [shape: f32[4,32], index: 4, kind: input, shape index: {}]   ;;  %s2478_s5 = inlined_call_operand.vmem [shape: f32[4,1], index: 5, kind: input, shape index: {}]   ;;  %s2479_s6 = inlined_call_operand.hbm [shape: f32[2,4,16,16], index: 6, kind: output, shape index: {}]  }
   0x1   :  { %13 = vsyncpa [#allocation5 + $0x1], 0  ;;  %s2113_s21 = smov 0   ;;  %s2115_s22 = smov 0  }
   0x2   :  { %s2117_s23 = smov 0   ;;  %s2119_s24 = smov 0  }
   0x3   :  { %s2121_s25 = smov 0   ;;  %s2123_s26 = smov 0  }
   0x4 LB: > { %s1653_s27 = sadd.s32 4294967295, %s2027_s26   ;;  %s1654_s28 = sadd.s32 4294967294, %s2027_s26   ;;  %s2027_s26 = sphi %s2123_s26, %s19_s26   ;;  %s2023_s25 = sphi %s2121_s25, %s2487_s25   ;;  %s2019_s24 = sphi %s2119_s24, %s2486_s24   ;;  %s2015_s23 = sphi %s2117_s23, %s2485_s23   ;;  %s2011_s22 = sphi %s2115_s22, %s2484_s22   ;;  %s2007_s21 = sphi %s2113_s21, %s2483_s21  }
   0x5   : > { %s31_s29 = sadd.s32 1, %s2023_s25  ;;  %s40_s30 = sadd.s32 1, %s2015_s23 }
   0x6   : > { %p33_p0 = scmp.ge.s32.totalorder %s31_s29, 2  ;;  %p47_p1 = scmp.ne.s32.totalorder %s2015_s23, %s2011_s22 }
   0x7   : > { %p48_p2 = scmp.eq.s32.totalorder %s2027_s26, 0  ;;  %p195_p3 = scmp.eq.s32.totalorder %s1653_s27, 1 }
   0x8   : > { %s2489_s29 = smov (%p33_p0, %s31_s29), 0  ;;  %p200_p6 = scmp.ne.s32.totalorder %s2011_s22, %s2007_s21 }
   0x9   : > { %p2152_p4 = por %p48_p2, %p47_p1  ;;  %p2156_p5 = por %p195_p3, %p47_p1 }
   0xa   : > { %s35_s9 = ssub.s32 %s2023_s25, %s2489_s29  ;;  %p201_p8 = scmp.eq.s32.totalorder %s1654_s28, 1 }
   0xb   : > { %p38_p7 = scmp.eq.s32.totalorder %s35_s9, 0  ;;  %p1656_p10 = scmp.ge.s32.totalorder %s2027_s26, 2 }
   0xc   : > { %p2167_p9 = por %p201_p8, %p200_p6 }
   0xd   : > { %s2165_s10 = scalar_select %p38_p7, %s2015_s23, %s40_s30  }
   0xe   : > { %229 = sbr.rel (%p1656_p10) target bundleno = 45 (0x2d), region = 32 }
  0x15   : > { %232 = sbr.rel (!%p2152_p4) target bundleno = 38 (0x26), region = 36  ;;  %s234_s12 = sand.u32 (%p2152_p4), 1, %s2015_s23  }
  0x16   : > { %s1767_s13 = smul.u32 (%p2152_p4), 96, %s2023_s25  ;;  %s1657_s14 = sshll.u32 (%p2152_p4), %s234_s12, 6 }
  0x17   : > { %s236_s18 = scalar_lea.vmem (%p2152_p4), [#allocation2], %s1657_s14   ;;  %s2029_s19 = smov (%p2152_p4), 0  }
  0x18   : > { %s246_s17 = scalar_lea.vmem (%p2152_p4), %s2473_s0, %s1767_s13  }
  0x1c LB: >> { %v331_v0 = vld [vmem:[%s246_s17] sm:$0xff]  ;;  %v333_v1 = vld [vmem:[%s246_s17 + $0x8] sm:$0xff]  ;;  %v335_v2 = vld [vmem:[%s246_s17 + $0x18] sm:$0xff]  ;;  %s325_s19 = sadd.s32 1, %s2031_s19   ;;  %s2031_s19 = sphi %s2029_s19, %s325_s19  }
  0x1d   : >> { %332 = vst [vmem:[%s236_s18] sm:$0xff] %v331_v0  ;;  %334 = vst [vmem:[%s236_s18 + $0x8] sm:$0xff] %v333_v1  ;;  %v337_v3 = vld [vmem:[%s246_s17 + $0x20] sm:$0xff]  ;;  %v339_v4 = vld [vmem:[%s246_s17 + $0x30] sm:$0xff]  ;;  %p324_p11 = scmp.ge.s32.totalorder %s325_s19, 1 }
  0x1e   : >> { %336 = vst [vmem:[%s236_s18 + $0x10] sm:$0xff] %v335_v2  ;;  %v341_v5 = vld [vmem:[%s246_s17 + $0x38] sm:$0xff]  ;;  %338 = vst [vmem:[%s236_s18 + $0x18] sm:$0xff] %v337_v3  ;;  %v343_v6 = vld [vmem:[%s246_s17 + $0x48] sm:$0xff] }
  0x1f   : >> { %340 = vst [vmem:[%s236_s18 + $0x20] sm:$0xff] %v339_v4  ;;  %342 = vst [vmem:[%s236_s18 + $0x28] sm:$0xff] %v341_v5  ;;  %v345_v7 = vld [vmem:[%s246_s17 + $0x50] sm:$0xff]  ;;  %327 = sbr.rel (!%p324_p11) target bundleno = 28 (0x1c), region = 190 }
  0x20   : >> { %344 = vst [vmem:[%s236_s18 + $0x30] sm:$0xff] %v343_v6  ;;  %346 = vst [vmem:[%s236_s18 + $0x38] sm:$0xff] %v345_v7 }
  0x26 PF: > { %390 = sbr.rel (!%p2152_p4) target bundleno = 45 (0x2d), region = 88  ;;  %s392_s20 = sand.u32 (%p2152_p4), 1, %s2015_s23  }
  0x27   : > { %s1668_s27 = smul.u32 (%p2152_p4), 96, %s2023_s25  ;;  %s1667_s28 = sshll.u32 (%p2152_p4), %s392_s20, 5 }
  0x28   : > { %s394_s13 = scalar_lea.vmem (%p2152_p4), [#allocation3], %s1667_s28 }
  0x29   : > { %s1562_s12 = scalar_lea.vmem (%p2152_p4), %s2474_s1, %s1668_s27 }
  0x2a   : > { %v1669_v8 = vld [vmem:[%s1562_s12 + $0x10] sm:$0xff] (%p2152_p4)  ;;  %v1670_v9 = vld [vmem:[%s1562_s12 + $0x28] sm:$0xff] (%p2152_p4)  ;;  %v1671_v10 = vld [vmem:[%s1562_s12 + $0x40] sm:$0xff] (%p2152_p4) }
  0x2b   : > { %435 = vst [vmem:[%s394_s13] sm:$0xff] (%p2152_p4), %v1669_v8  ;;  %437 = vst [vmem:[%s394_s13 + $0x8] sm:$0xff] (%p2152_p4), %v1670_v9  ;;  %v1672_v11 = vld [vmem:[%s1562_s12 + $0x58] sm:$0xff] (%p2152_p4) }
  0x2c   : > { %439 = vst [vmem:[%s394_s13 + $0x10] sm:$0xff] (%p2152_p4), %v1671_v10  ;;  %441 = vst [vmem:[%s394_s13 + $0x18] sm:$0xff] (%p2152_p4), %v1672_v11 }
  0x2d PF: > { %p1673_p12 = scmp.ge.s32.totalorder %s2027_s26, 1  ;;  %p446_p13 = scmp.lt.s32.totalorder %s2027_s26, 3 }
  0x2f   : > { %p447_p0 = pnand %p1673_p12, %p446_p13 }
  0x30   : > { %s2191_s7 = sand.u32 (!%p447_p0), 1, %s2011_s22   ;;  %v518_v12 = vlaneseq (!%p447_p0)  ;;  %v2033_v13 = vmov (!%p447_p0), 1983009808   ;;  %v2034_v15 = vmov (!%p447_p0), 1934713408   ;;  %v2035_v17 = vmov (!%p447_p0), 0.0  }
  0x31   : > { %450 = sbr.rel (%p447_p0) target bundleno = 986 (0x3da), region = 126  ;;  %s1674_s14 = sshll.u32 (!%p447_p0), %s2191_s7, 6  ;;  %v516_v14 = vunpack.c.l.s4 (!%p447_p0), %v2033_v13  ;;  %v548_v16 = vunpack.c.l.s4 (!%p447_p0), %v2034_v15  ;;  %1009 = vmatprep.mubr.f32.mxu0 (!%p447_p0), %v2035_v17  ;;  %vm768_vm0 = vcmask (!%p447_p0), 130048   ;;  %vm770_vm1 = vcmask (!%p447_p0), 277504  }
  0x32   : > { %v519_v18 = vshrl.u32 (!%p447_p0), %v518_v12, 7  ;;  %s455_s15 = scalar_lea.vmem (!%p447_p0), [#allocation2], %s1674_s14  ;;  %s1675_s16 = sshll.u32 (!%p447_p0), %s2191_s7, 5  ;;  %vm754_vm2 = vcmask (!%p447_p0), 146432   ;;  %vm772_vm3 = vcmask (!%p447_p0), 424960   ;;  %vm756_vm4 = vcmask (!%p447_p0), 293888  }
  0x33   : > { %v502_v19 = vld [vmem:[%s455_s15 + $0x8] sm:$0xff] (!%p447_p0)  ;;  %v504_v20 = vld [vmem:[%s455_s15 + $0x18] sm:$0xff] (!%p447_p0)  ;;  %v517_v22 = vunpack.c.0.s8 (!%p447_p0), %v516_v14  ;;  %v549_v23 = vunpack.c.0.s8 (!%p447_p0), %v548_v16  ;;  %v501_v26 = vld [vmem:[%s455_s15] sm:$0xff] (!%p447_p0)  ;;  %s462_s17 = scalar_lea.vmem (!%p447_p0), [#allocation3], %s1675_s16  ;;  %s2036_s18 = smov (!%p447_p0), 52   ;;  %vm758_vm5 = vcmask (!%p447_p0), 441344  }
  0x34   : > { %v506_v21 = vld [vmem:[%s455_s15 + $0x28] sm:$0xff] (!%p447_p0)  ;;  %v508_v24 = vld [vmem:[%s455_s15 + $0x38] sm:$0xff] (!%p447_p0)  ;;  %v503_v27 = vld [vmem:[%s455_s15 + $0x10] sm:$0xff] (!%p447_p0)  ;;  %s2037_s19 = smov (!%p447_p0), 16   ;;  %s2038_s20 = smov (!%p447_p0), 36   ;;  %vm774_vm6 = vcmask (!%p447_p0), 572416  }
  0x35   : > { %v581_v25 = vcombine.low (!%p447_p0), %v502_v19, %v506_v21  ;;  %v2197_v28 = vsub.s32 (!%p447_p0), %v517_v22, %v519_v18  ;;  %v597_v29 = vcombine.low (!%p447_p0), %v504_v20, %v508_v24  ;;  %v505_v30 = vld [vmem:[%s455_s15 + $0x20] sm:$0xff] (!%p447_p0)  ;;  %v507_v31 = vld [vmem:[%s455_s15 + $0x30] sm:$0xff] (!%p447_p0)  ;;  %v2199_v36 = vsub.s32 (!%p447_p0), %v549_v23, %v519_v18  ;;  %s2039_s27 = smov (!%p447_p0), 18   ;;  %s2040_s28 = smov (!%p447_p0), 126  }
  0x36   : > { %v513_v32 = vcombine.low (!%p447_p0), %v501_v26, %v505_v30  ;;  %v529_v33 = vcombine.low (!%p447_p0), %v503_v27, %v507_v31  ;;  %v514_v34 = vcombine.high (!%p447_p0), %v501_v26, %v505_v30  ;;  %v530_v35 = vcombine.high (!%p447_p0), %v503_v27, %v507_v31  ;;  %s2041_s30 = smov (!%p447_p0), 34   ;;  %v1931_v0 = vld [vmem:[%s462_s17] ss:$16 sps:$4 sm:$0x77] (!%p447_p0)   ;;  %s2042_s9 = smov (!%p447_p0), 54  }
  0x37   : > { %v582_v37 = vcombine.high (!%p447_p0), %v502_v19, %v506_v21  ;;  %v589_v38 = vrot.slane (!%p447_p0), %v581_v25, %v2197_v28  ;;  %v605_v39 = vrot.slane (!%p447_p0), %v597_v29, %v2197_v28  ;;  %v598_v44 = vcombine.high (!%p447_p0), %v504_v20, %v508_v24  ;;  %v1932_v1 = vld [vmem:[%s462_s17 + $0x8] ss:$16 sps:$4 sm:$0x77] (!%p447_p0)   ;;  %s2043_s12 = smov (!%p447_p0), 70   ;;  %s2044_s13 = smov (!%p447_p0), 124  }
  0x38   : > { %v521_v40 = vrot.slane %v513_v32, %v2197_v28  ;;  %v537_v41 = vrot.slane %v529_v33, %v2197_v28  ;;  %v528_v42 = vrot.slane %v514_v34, %v2197_v28  ;;  %v544_v43 = vrot.slane %v530_v35, %v2197_v28  ;;  %s2045_s15 = smov 14   ;;  %s2046_s16 = smov 72  }
  0x39   : > { %v614_v45 = vcombine.high %v589_v38, %v605_v39  ;;  %v613_v46 = vcombine.low %v589_v38, %v605_v39  ;;  %v596_v53 = vrot.slane %v582_v37, %v2197_v28  ;;  %v612_v56 = vrot.slane %v598_v44, %v2197_v28  ;;  %s2047_s17 = smov 88  }
  0x3a   : > { %v546_v47 = vcombine.high %v521_v40, %v537_v41  ;;  %v545_v48 = vcombine.low %v521_v40, %v537_v41  ;;  %v562_v49 = vcombine.high %v528_v42, %v544_v43  ;;  %v561_v2 = vcombine.low %v528_v42, %v544_v43 }
  0x3b   : > { %v628_v50 = vrot.slane %v614_v45, %v2199_v36  ;;  %v621_v51 = vrot.slane %v613_v46, %v2199_v36  ;;  %v630_v60 = vcombine.high %v596_v53, %v612_v56  ;;  %v629_v3 = vcombine.low %v596_v53, %v612_v56 }
  0x3c   : > { %v2211_v52 = vrot.slane %v545_v48, %v2199_v36  ;;  %v560_v54 = vrot.slane %v546_v47, %v2199_v36  ;;  %v576_v55 = vrot.slane %v562_v49, %v2199_v36  ;;  %v656_v5 = vrot.slane %v1931_v0, %v2197_v28  ;;  %v905_v0 = vld [vmem:[%s2476_s3 + $0x10] sm:$0xff] }
  0x3d   : > { %719 = vrot.lane.b32.xlu1 %v628_v50, %s2036_s18  ;;  %711 = vrot.lane.b32.xlu0 %v621_v51, %s2037_s19  ;;  %v645_v58 = vcombine.high %v621_v51, %v2035_v17  ;;  %v646_v61 = vcombine.high %v628_v50, %v2035_v17  ;;  %v644_v63 = vrot.slane %v630_v60, %v2199_v36  ;;  %s2048_s18 = smov 32   ;;  %s2049_s19 = smov 90   ;;  %vm782_vm7 = vcmask 113664   ;;  %v2268_v60 = vld [vmem:[%s2475_s2] sm:$0xff] }
  0x3e   : > { %v577_v57 = vcombine.high %v2211_v52, %v2035_v17  ;;  %v580_v59 = vcombine.high %v576_v55, %v2035_v17  ;;  %v578_v62 = vcombine.high %v560_v54, %v2035_v17  ;;  %v664_v6 = vrot.slane %v1932_v1, %v2197_v28  ;;  %1720 = vmatprep.mubr.msk.f32.mxu1 %vm756_vm4, %v2268_v60  ;;  %v906_v1 = vld [vmem:[%s2476_s3 + $0x18] sm:$0xff] }
  0x3f   : > { %v648_v4 = vcombine.high %v644_v63, %v2035_v17  ;;  %v569_v7 = vrot.slane %v561_v2, %v2199_v36  ;;  %v637_v8 = vrot.slane %v629_v3, %v2199_v36  ;;  %vm760_vm8 = vcmask 588800   ;;  %v1132_v2 = vld [vmem:[%s2478_s5] sm:$0xf] }
  0x40   : > { %v665_v9 = vcombine.low %v656_v5, %v664_v6  ;;  %v666_v14 = vcombine.high %v656_v5, %v664_v6  ;;  %vm776_vm9 = vcmask 719872   ;;  %vm784_vm10 = vcmask 261120  }
  0x41   : > { %687 = vrot.lane.b32.xlu0 %v560_v54, %s2038_s20  ;;  %683 = vrot.lane.b32.xlu1 %v577_v57, %s2039_s27  ;;  %v579_v11 = vcombine.high %v569_v7, %v2035_v17  ;;  %v647_v12 = vcombine.high %v637_v8, %v2035_v17  ;;  %s2050_s20 = smov 106   ;;  %s2051_s27 = smov 50   ;;  %vm762_vm11 = vcmask 736256   ;;  %vm778_vm12 = vcmask 867328  }
  0x42   : > { %v673_v10 = vrot.slane %v665_v9, %v2199_v36  ;;  %v681_v15 = vrot.slane %v666_v14, %v2199_v36  ;;  %vm786_vm13 = vcmask 408576   ;;  %vm764_vm14 = vcmask 883712  }
  0x43   : > { %vm788_vm15 = vcmask 556032  }
  0x44   : > { %v674_v13 = vcombine.high %v673_v10, %v2035_v17 }
  0x45   : > { %707 = vrot.lane.b32.xlu0 %v580_v59, %s2040_s28  ;;  %715 = vrot.lane.b32.xlu1 %v645_v58, %s2041_s30  ;;  %s2052_s30 = smov 108  }
  0x49   : > { %691 = vrot.lane.b32.xlu0 %v578_v62, %s2042_s9  ;;  %723 = vrot.lane.b32.xlu1 %v646_v61, %s2043_s12  ;;  %s2053_s9 = smov 68   ;;  %s2054_s12 = smov 109   ;;  %v904_v61 = vld [vmem:[%s2476_s3 + $0x8] sm:$0xff]  ;;  %v903_v62 = vld [vmem:[%s2476_s3] sm:$0xff] }
  0x4d   : > { %735 = vrot.lane.b32.xlu0 %v644_v63, %s2044_s13  ;;  %739 = vrot.lane.b32.xlu1 %v648_v4, %s2045_s15  ;;  %s2055_s13 = smov 92   ;;  %s2056_s15 = smov 127   ;;  %v2059_v63 = vmov 0  }
  0x4e   : > { %1930 = vset.pattern.permute.xlu1 %v2059_v63  ;;  %1929 = vset.pattern.permute.xlu0 %v2059_v63 }
  0x51   : > { %695 = vrot.lane.b32.xlu0 %v569_v7, %s2046_s16  ;;  %727 = vrot.lane.b32.xlu1 %v637_v8, %s2047_s17  ;;  %s2057_s16 = smov 110   ;;  %s2073_s17 = smov 40  }
  0x55   : > { %743 = vrot.lane.b32.xlu0 %v673_v10, %s2048_s18  ;;  %699 = vrot.lane.b32.xlu1 %v579_v11, %s2049_s19  ;;  %s2058_s18 = smov 91  }
  0x59   : > { %731 = vrot.lane.b32.xlu0 %v647_v12, %s2050_s20  ;;  %747 = vrot.lane.b32.xlu1 %v674_v13, %s2051_s27  ;;  %s2064_s20 = smov 56   ;;  %s2065_s27 = smov 20  }
  0x5d   : > { %703 = vrot.lane.b32.xlu0 %v576_v55, %s2052_s30  ;;  %751 = vrot.lane.b32.xlu1 %v681_v15, %s2053_s9  ;;  %s2066_s9 = smov 74  }
  0xaf   : > { %v720_v16 = vpop.permute.xlu1 %719  ;;  %v712_v18 = vpop.permute.xlu0 %711 }
  0xb3   : > { %v688_v19 = vpop.permute.xlu0 %687  ;;  %v684_v20 = vpop.permute.xlu1 %683 }
  0xb4   : > { %v755_v34 = vsel %vm754_vm2, %v2211_v52, %v684_v20  ;;  %vm780_vm2 = vcmask 1014784  }
  0xb5   : > { %v757_v39 = vsel %vm756_vm4, %v755_v34, %v688_v19 }
  0xb7   : > { %v708_v21 = vpop.permute.xlu0 %707  ;;  %v716_v22 = vpop.permute.xlu1 %715 }
  0xb8   : > { %v769_v30 = vsel %vm768_vm0, %v708_v21, %v712_v18 }
  0xb9   : > { %v771_v31 = vsel %vm770_vm1, %v769_v30, %v716_v22  ;;  %vm766_vm1 = vcmask 1031168  }
  0xba   : > { %v773_v35 = vsel %vm772_vm3, %v771_v31, %v720_v16  ;;  %vm802_vm3 = vcmask 1039360  }
  0xbb   : > { %v692_v23 = vpop.permute.xlu0 %691  ;;  %v724_v24 = vpop.permute.xlu1 %723 }
  0xbc   : > { %v759_v40 = vsel %vm758_vm5, %v757_v39, %v692_v23  ;;  %v775_v41 = vsel %vm774_vm6, %v773_v35, %v724_v24  ;;  %vm886_vm5 = vcmask 1043456   ;;  %vm825_vm6 = vcmask 900096  }
  0xbf   : > { %v736_v25 = vpop.permute.xlu0 %735  ;;  %v740_v26 = vpop.permute.xlu1 %739 }
  0xc0   : > { %v783_v42 = vsel %vm782_vm7, %v736_v25, %v740_v26  ;;  %vm837_vm7 = vcmask 891904  }
  0xc3   : > { %v696_v27 = vpop.permute.xlu0 %695  ;;  %v728_v29 = vpop.permute.xlu1 %727 }
  0xc4   : > { %v761_v43 = vsel %vm760_vm8, %v759_v40, %v696_v27  ;;  %v777_v44 = vsel %vm776_vm9, %v775_v41, %v728_v29  ;;  %vm860_vm8 = vcmask 752640   ;;  %vm872_vm9 = vcmask 744448  }
  0xc7   : > { %v744_v32 = vpop.permute.xlu0 %743  ;;  %v700_v33 = vpop.permute.xlu1 %699 }
  0xc8   : > { %v785_v45 = vsel %vm784_vm10, %v783_v42, %v744_v32  ;;  %v763_v46 = vsel %vm762_vm11, %v761_v43, %v700_v33 }
  0xcb   : > { %v732_v37 = vpop.permute.xlu0 %731  ;;  %v748_v38 = vpop.permute.xlu1 %747 }
  0xcc   : > { %v779_v47 = vsel %vm778_vm12, %v777_v44, %v732_v37  ;;  %v787_v48 = vsel %vm786_vm13, %v785_v45, %v748_v38 }
  0xcd   : > { %v2249_v54 = vsel %vm780_vm2, %v779_v47, %v736_v25 }
  0xce   : > { %v794_v57 = vrot.slane %v2249_v54, 4 }
  0xcf   : > { %v704_v49 = vpop.permute.xlu0 %703  ;;  %v752_v50 = vpop.permute.xlu1 %751 }
  0xd0   : > { %v765_v51 = vsel %vm764_vm14, %v763_v46, %v704_v49  ;;  %v2243_v52 = vsel %vm788_vm15, %v787_v48, %v752_v50 }
  0xd1   : > { %v2246_v53 = vsel %vm766_vm1, %v765_v51, %v708_v21  ;;  %835 = vrot.lane.b32.xlu1 %v2243_v52, %s2054_s12  ;;  %v1899_v55 = vpack.i.bf16 %v2243_v52, %v2249_v54  ;;  %v795_v56 = vrot.slane %v2243_v52, 4 }
  0xd2   : > { %808 = vrot.lane.b32.xlu0 %v2246_v53, %s2040_s28  ;;  %v793_v59 = vrot.slane %v2246_v53, 4 }
  0xd3   : > { %v1909_v58 = vpack.i.bf16 %v795_v56, %v794_v57 }
  0xd5   : > { %1900 = vrot.lane.b32.xlu1 %v1899_v55, %s2040_s28  ;;  %s2071_s28 = smov 22  }
  0xd6   : > { %833 = vrot.lane.b32.xlu0 %v2249_v54, %s2054_s12 }
  0xd9   : > { %1905 = vrot.lane.b32.xlu1 %v1899_v55, %s2055_s13 }
  0xda   : > { %1910 = vrot.lane.b32.xlu0 %v1909_v58, %s2056_s15 }
  0xdd   : > { %831 = vrot.lane.b32.xlu1 %v2246_v53, %s2054_s12  ;;  %s2067_s12 = smov 38  }
  0xde   : > { %1915 = vrot.lane.b32.xlu0 %v1909_v58, %s2057_s16 }
  0xe1   : > { %796 = vrot.lane.b32.xlu1 %v793_v59, %s2056_s15  ;;  %s2070_s15 = smov 112  }
  0xe2   : > { %1920 = vrot.lane.b32.xlu0 %v1909_v58, %s2052_s30 }
  0xe5   : > { %819 = vrot.lane.b32.xlu1 %v793_v59, %s2057_s16 }
  0xe6   : > { %1925 = vrot.lane.b32.xlu0 %v1909_v58, %s2058_s18 }
  0xe9   : > { %854 = vrot.lane.b32.xlu1 %v2246_v53, %s2055_s13 }
  0xea   : > { %843 = vrot.lane.b32.xlu0 %v793_v59, %s2052_s30  ;;  %s2068_s30 = smov 94  }
  0xed   : > { %880 = vrot.lane.b32.xlu1 %v2249_v54, %s2049_s19 }
  0xee   : > { %866 = vrot.lane.b32.xlu0 %v793_v59, %s2058_s18  ;;  %s2063_s18 = smov 2  }
  0xf1   : > { %878 = vrot.lane.b32.xlu1 %v2246_v53, %s2049_s19 }
  0xf2   : > { %882 = vrot.lane.b32.xlu0 %v2243_v52, %s2049_s19  ;;  %s2062_s19 = smov 4  }
  0xf5   : > { %914 = vperm.xlu1 %1930, %v904_v61  }
  0xf6   : > { %909 = vperm.xlu0 %1929, %v903_v62  }
  0xf9   : > { %919 = vperm.xlu1 %1930, %v905_v0  }
  0xfa   : > { %924 = vperm.xlu0 %1929, %v906_v1  }
  0xfd   : > { %1135 = vperm.xlu1 %1930, %v1132_v2  }
 0x143   : > { %v2296_v3 = vpop.permute.xlu1 %835 }
 0x144   : > { %v809_v4 = vpop.permute.xlu0 %808 }
 0x147   : > { %v1901_v5 = vpop.permute.xlu1 %1900 }
 0x148   : > { %v2298_v6 = vpop.permute.xlu0 %833  ;;  %v1903_v11 = vunpack.i.h.bf16 %v1901_v5  ;;  %v1902_v12 = vunpack.i.l.bf16 %v1901_v5  ;;  %v900_v5 = vld [vmem:[%s2475_s2 + $0x8] sm:$0xff] }
 0x149   : > { %v2323_v45 = vsel %vm837_vm7, %v2298_v6, %v2296_v3 }
 0x14a   : > { %v815_v22 = vsel %vm766_vm1, %v1902_v12, %v1903_v11  ;;  %v814_v39 = vsel %vm766_vm1, %v809_v4, %v1902_v12 }
 0x14b   : > { %v2300_v7 = vpop.permute.xlu1 %1905 }
 0x14c   : > { %v1911_v8 = vpop.permute.xlu0 %1910  ;;  %v1908_v33 = vunpack.i.h.bf16 %v2300_v7  ;;  %v1907_v34 = vunpack.i.l.bf16 %v2300_v7 }
 0x14d   : > { %v1913_v9 = vunpack.i.h.bf16 %v1911_v8  ;;  %v1912_v10 = vunpack.i.l.bf16 %v1911_v8  ;;  %v901_v8 = vld [vmem:[%s2475_s2 + $0x10] sm:$0xff] }
 0x14e   : > { %v862_v49 = vsel %vm860_vm8, %v1907_v34, %v1908_v33 }
 0x14f   : > { %v832_v13 = vpop.permute.xlu1 %831  ;;  %v804_v18 = vsel %vm802_vm3, %v1912_v10, %v1913_v9  ;;  %v889_v20 = vsel %vm886_vm5, %v2243_v52, %v1913_v9 }
 0x150   : > { %v1916_v14 = vpop.permute.xlu0 %1915  ;;  %v888_v26 = vsel %vm886_vm5, %v2249_v54, %v804_v18  ;;  %v2336_v61 = vsel %vm837_vm7, %v832_v13, %v2298_v6 }
 0x151   : > { %v1918_v15 = vunpack.i.h.bf16 %v1916_v14  ;;  %v1917_v16 = vunpack.i.l.bf16 %v1916_v14 }
 0x153   : > { %v797_v19 = vpop.permute.xlu1 %796  ;;  %v892_v21 = vsel %vm886_vm5, %v1903_v11, %v1918_v15  ;;  %v827_v23 = vsel %vm825_vm6, %v1917_v16, %v1918_v15  ;;  %v2060_v11 = vmov 0.0|0.0  }
 0x154   : > { %v1921_v24 = vpop.permute.xlu0 %1920  ;;  %v1745_v25 = vpack.c.bf16 %v892_v21, %v889_v20  ;;  %v891_v27 = vsel %vm886_vm5, %v815_v22, %v827_v23  ;;  %v803_v29 = vsel %vm802_vm3, %v797_v19, %v1912_v10  ;;  %v902_v10 = vld [vmem:[%s2475_s2 + $0x18] sm:$0xff] }
 0x155   : > { %v1923_v30 = vunpack.i.h.bf16 %v1921_v24  ;;  %v1922_v31 = vunpack.i.l.bf16 %v1921_v24  ;;  %v1737_v32 = vpack.c.bf16 %v891_v27, %v888_v26  ;;  %v887_v40 = vsel %vm886_vm5, %v2246_v53, %v803_v29 }
 0x156   : > { %1746 = vmatprep.subr.bf16.mxu1 %v1745_v25 }
 0x157   : > { %v820_v35 = vpop.permute.xlu1 %819  ;;  %1738 = vmatprep.subr.bf16.mxu0 %v1737_v32  ;;  %1748 = vmatpush3.bf16.msra.mxu1 %v1745_v25  ;;  %v850_v41 = vsel %vm764_vm14, %v1922_v31, %v1923_v30  ;;  %v895_v50 = vsel %vm886_vm5, %v2296_v3, %v1923_v30 }
 0x158   : > { %v826_v37 = vsel %vm825_vm6, %v820_v35, %v1917_v16  ;;  %v1926_v38 = vpop.permute.xlu0 %1925  ;;  %v894_v54 = vsel %vm886_vm5, %v2323_v45, %v850_v41 }
 0x159   : > { %v1928_v42 = vunpack.i.h.bf16 %v1926_v38  ;;  %v1927_v43 = vunpack.i.l.bf16 %v1926_v38  ;;  %v890_v44 = vsel %vm886_vm5, %v814_v39, %v826_v37 }
 0x15a   : > { %v1739_v46 = vpack.c.bf16 %v890_v44, %v887_v40 }
 0x15b   : > { %v874_v47 = vsel %vm872_vm9, %v1927_v43, %v1928_v42  ;;  %v855_v48 = vpop.permute.xlu1 %854  ;;  %v898_v51 = vsel %vm886_vm5, %v1908_v33, %v1928_v42 }
 0x15c   : > { %v844_v52 = vpop.permute.xlu0 %843  ;;  %1740 = vmatpush1.bf16.msra.mxu0 %v1739_v46  ;;  %v1749_v53 = vpack.c.bf16 %v898_v51, %v895_v50  ;;  %v897_v55 = vsel %vm886_vm5, %v862_v49, %v874_v47  ;;  %v861_v62 = vsel %vm860_vm8, %v855_v48, %v1907_v34  ;;  %v1131_v47 = vld [vmem:[%s2477_s4] sm:$0xf] }
 0x15d   : > { %v1741_v56 = vpack.c.bf16 %v897_v55, %v894_v54  ;;  %v849_v57 = vsel %vm764_vm14, %v844_v52, %v1922_v31 }
 0x15e   : > { %1750 = vmatprep.subr.bf16.mxu1 %v1749_v53  ;;  %v893_v0 = vsel %vm886_vm5, %v2336_v61, %v849_v57 }
 0x15f   : > { %v881_v58 = vpop.permute.xlu1 %880  ;;  %1742 = vmatprep.subr.bf16.mxu0 %v1741_v56  ;;  %1752 = vmatpush3.bf16.msra.mxu1 %v1749_v53 }
 0x160   : > { %v867_v59 = vpop.permute.xlu0 %866 }
 0x161   : > { %v873_v63 = vsel %vm872_vm9, %v867_v59, %v1927_v43 }
 0x162   : > { %v896_v1 = vsel %vm886_vm5, %v861_v62, %v873_v63 }
 0x163   : > { %v1743_v2 = vpack.c.bf16 %v896_v1, %v893_v0  ;;  %v879_v7 = vpop.permute.xlu1 %878 }
 0x164   : > { %v883_v4 = vpop.permute.xlu0 %882  ;;  %v884_v9 = vsel %vm762_vm11, %v879_v7, %v881_v58 }
 0x165   : > { %1744 = vmatpush1.bf16.msra.mxu0 %v1743_v2  ;;  %1718 = vmatprep.subr.msk.mxu1 %vm886_vm5, %v883_v4  ;;  %v885_v6 = vsel %vm762_vm11, %v881_v58, %v883_v4  ;;  %vm2061_vm11 = vmmov 0  }
 0x166   : > { %1677 = vmatprep.subr.msk.mxu0 %vm886_vm5, %v885_v6  ;;  %1719 = vmatpush3.msk.msra.mxu1 %vm886_vm5, %v883_v4 }
 0x167   : > { %1721 = vmatmul.mubr.msk.f32.vlgmr.msra.gmra.mrb[0].mxu1 %vm756_vm4, %v900_v5 }
 0x168   : > { %1723 = vmatprep.mubr.msk.f32.mxu1 %vm756_vm4, %v901_v8 }
 0x169   : > { %1678 = vmatpush1.msk.msra.mxu0 %vm886_vm5, %v884_v9 }
 0x16a   : > { %1679 = vmatmul.mubr.msk.f32.vlgmr.msra.gmra.mrb[0].mxu0 %vm756_vm4, %v2268_v60  ;;  %1761 = vmatprep.subr.bf16.mxu0 %v2060_v11 }
 0x16b   : > { %1724 = vmatmul.mubr.msk.f32.gmra.mrb[2].mxu1 %vm756_vm4, %v902_v10  ;;  %1015 = vmatprep.mubr.f32.mxu0 %v2035_v17 }
 0x16c   : > { %1205 = vmatprep.mubr.f32.mxu1 %v2035_v17 }
 0x16e   : > { %1680 = vmatmul.mubr.msk.f32.gmra.mrb[2].mxu0 %vm756_vm4, %v900_v5 }
 0x16f   : > { %1021 = vmatprep.mubr.f32.mxu0 %v2035_v17 }
 0x172   : > { %1681 = vmatmul.mubr.msk.f32.gmra.mrb[4].mxu0 %vm756_vm4, %v901_v8 }
 0x173   : > { %1027 = vmatprep.mubr.f32.mxu0 %v2035_v17 }
 0x174   : > { %v915_v12 = vpop.permute.xlu1 %914 }
 0x175   : > { %v910_v60 = vpop.permute.xlu0 %909 }
 0x176   : > { %1682 = vmatmul.mubr.msk.f32.gmra.mrb[6].mxu0 %vm756_vm4, %v902_v10  ;;  %vm1309_vm4 = vcmask 15360  }
 0x177   : > { %1734 = vmatprep.mubr.msk.f32.mxu0 %vm2061_vm11, %v2035_v17 }
 0x178   : > { %v920_v21 = vpop.permute.xlu1 %919 }
 0x179   : > { %v925_v18 = vpop.permute.xlu0 %924 }
 0x17c   : > { %v1136_v63 = vpop.permute.xlu1 %1135 }
 0x23a   : > { %v1722_v13 = vpop.f32.mrb[0].mxu1 }
 0x23b   : > { %v1106_v14 = vadd.f32 %v1722_v13, %v915_v12  ;;  %v1100_v15 = vpop.f32.mrb[1].mxu1 }
 0x23c   : > { %v1101_v16 = vadd.f32 %v1100_v15, %v910_v60 }
 0x23d   : > { %v1124_v19 = vmax.f32 %v1106_v14, 0.0  ;;  %v1011_v20 = vpop.f32.mrb[0].mxu0 }
 0x23e   : > { %v1121_v22 = vmax.f32 %v1101_v16, 0.0  ;;  %v1013_v23 = vpop.f32.mrb[1].mxu0  ;;  %v1725_v24 = vpop.f32.mrb[2].mxu1  ;;  %v1012_v29 = vadd.f32 %v1011_v20, %v910_v60 }
 0x23f   : > { %v1116_v25 = vadd.f32 %v1725_v24, %v925_v18  ;;  %v1110_v26 = vpop.f32.mrb[3].mxu1  ;;  %v1014_v31 = vadd.f32 %v1013_v23, %v910_v60 }
 0x240   : > { %v1762_v27 = vpack.c.bf16 %v1124_v19, %v1121_v22  ;;  %v1111_v30 = vadd.f32 %v1110_v26, %v920_v21  ;;  %v1119_v38 = vmax.f32 %v1012_v29, 0.0 }
 0x241   : > { %v1130_v17 = vmax.f32 %v1116_v25, 0.0  ;;  %v1017_v32 = vpop.f32.mrb[2].mxu0  ;;  %v1120_v41 = vmax.f32 %v1014_v31, 0.0 }
 0x242   : > { %v1127_v33 = vmax.f32 %v1111_v30, 0.0  ;;  %v1018_v34 = vadd.f32 %v1017_v32, %v915_v12  ;;  %v1019_v35 = vpop.f32.mrb[3].mxu0  ;;  %1763 = vmatpush3.bf16.msra.mxu0 %v1762_v27 }
 0x243   : > { %v1020_v37 = vadd.f32 %v1019_v35, %v915_v12  ;;  %1764 = vmatprep.subr.bf16.mxu0 %v2060_v11 }
 0x244   : > { %v1765_v39 = vpack.c.bf16 %v1130_v17, %v1127_v33  ;;  %v1122_v40 = vmax.f32 %v1018_v34, 0.0 }
 0x245   : > { %v1123_v42 = vmax.f32 %v1020_v37, 0.0  ;;  %v1023_v43 = vpop.f32.mrb[4].mxu0 }
 0x246   : > { %v1755_v44 = vpack.c.bf16 %v1122_v40, %v1119_v38  ;;  %v1025_v46 = vpop.f32.mrb[5].mxu0  ;;  %1766 = vmatpush3.bf16.msra.mxu0 %v1765_v39  ;;  %v1024_v49 = vadd.f32 %v1023_v43, %v920_v21 }
 0x247   : > { %v1753_v48 = vpack.c.bf16 %v1123_v42, %v1120_v41  ;;  %v1026_v50 = vadd.f32 %v1025_v46, %v920_v21 }
 0x248   : > { %v1125_v55 = vmax.f32 %v1024_v49, 0.0 }
 0x249   : > { %v1029_v51 = vpop.f32.mrb[6].mxu0  ;;  %1754 = vmatprep.subr.bf16.mxu1 %v1753_v48  ;;  %1735 = vmatmul.mubr.msk.f32.vlgmr.msra.gmra.mrb[8].mxu0 %vm784_vm10, %v1131_v47  ;;  %v1126_v57 = vmax.f32 %v1026_v50, 0.0 }
 0x24a   : > { %v1030_v52 = vadd.f32 %v1029_v51, %v925_v18  ;;  %v1031_v53 = vpop.f32.mrb[7].mxu0  ;;  %1756 = vmatpush1.bf16.msra.mxu1 %v1755_v44 }
 0x24b   : > { %v1032_v54 = vadd.f32 %v1031_v53, %v925_v18 }
 0x24c   : > { %v1128_v56 = vmax.f32 %v1030_v52, 0.0 }
 0x24d   : > { %v1129_v58 = vmax.f32 %v1032_v54, 0.0 }
 0x24e   : > { %v1759_v59 = vpack.c.bf16 %v1128_v56, %v1125_v55 }
 0x24f   : > { %v1757_v62 = vpack.c.bf16 %v1129_v58, %v1126_v57 }
 0x251   : > { %1758 = vmatprep.subr.bf16.mxu1 %v1757_v62 }
 0x252   : > { %1760 = vmatpush1.bf16.msra.mxu1 %v1759_v59 }
 0x255   : > { %1688 = vmatmul.mubr.msk.f32.vlgmr.msra.gmra.mrb[4].mxu1 %vm784_vm10, %v1131_v47  ;;  %vm1335_vm10 = vcmask 31744  }
 0x31c   : > { %v1278_v0 = vpop.f32.mrb[8].mxu0 }
 0x31d   : > { %v1279_v1 = vadd.f32 %v1278_v0, %v1136_v63  ;;  %v1736_v2 = vpop.f32.mrb[9].mxu0 }
 0x31f   : > { %v1284_v4 = vadd.f32 %v1279_v1, %v2296_v3 }
 0x321   : > { %1333 = vrot.lane.b32.xlu1 %v1284_v4, %s2062_s19 }
 0x328   : > { %v1207_v5 = vpop.f32.mrb[4].mxu1 }
 0x329   : > { %v1208_v7 = vadd.f32 %v1207_v5, %v1136_v63  ;;  %v1209_v6 = vpop.f32.mrb[5].mxu1 }
 0x32a   : > { %v1210_v9 = vadd.f32 %v1209_v6, %v1136_v63 }
 0x32b   : > { %v1282_v8 = vadd.f32 %v1208_v7, %v2336_v61 }
 0x32c   : > { %v1283_v3 = vadd.f32 %v1210_v9, %v2323_v45 }
 0x32d   : > { %1289 = vrot.lane.b32.xlu1 %v1282_v8, %s2055_s13  ;;  %1305 = vrot.lane.b32.xlu0 %v1282_v8, %s2063_s18  ;;  %s2069_s13 = smov 58  }
 0x331   : > { %1295 = vrot.lane.b32.xlu1 %v1282_v8, %s2064_s20  ;;  %1286 = vrot.lane.b32.xlu0 %v1282_v8, %s2057_s16  ;;  %s2072_s16 = smov 76   ;;  %s2074_s20 = smov 114  }
 0x335   : > { %1301 = vrot.lane.b32.xlu1 %v1282_v8, %s2065_s27  ;;  %1292 = vrot.lane.b32.xlu0 %v1282_v8, %s2066_s9 }
 0x339   : > { %1307 = vrot.lane.b32.xlu1 %v1283_v3, %s2063_s18  ;;  %1298 = vrot.lane.b32.xlu0 %v1282_v8, %s2067_s12 }
 0x33d   : > { %1315 = vrot.lane.b32.xlu1 %v1283_v3, %s2068_s30  ;;  %1331 = vrot.lane.b32.xlu0 %v1283_v3, %s2062_s19  ;;  %s2391_s19 = scalar_lea.vmem [#allocation4], %s1674_s14  ;;  %s1695_s14 = sshll.u32 %s2019_s24, 10 }
 0x33e   : > { %s1501_s18 = sshll.u32 %s2391_s19, 4  ;;  %s2414_s12 = scalar_lea.hbm %s2479_s6, %s1695_s14  ;;  %s2416_s18 = int_to_ptr.vmem [resolvable:$true] %s1501_s18 }
 0x33f   : > { %s1486_s24 = scalar_lea.sflag [#allocation5], %s2191_s7  ;;  %s1933_s30 = scalar_lea.vmem %s2416_s18, 1024 }
 0x340   : > { %p1934_p1 = scmp.ne.s32.totalorder %s2416_s18, %s1933_s30 }
 0x341   : > { %1321 = vrot.lane.b32.xlu1 %v1283_v3, %s2069_s13  ;;  %1312 = vrot.lane.b32.xlu0 %v1283_v3, %s2070_s15  ;;  %s2075_s13 = smov [#allocation4]  }
 0x342   : > { %p1935_p2 = pnand %p1934_p1, %p2156_p5  ;;  %s1937_s15 = sshll.u32 %s2075_s13, 4  ;;  %s1938_s15 = int_to_ptr.vmem [resolvable:$false] %s1937_s15 }
 0x343   : > { %p1940_p4 = scmp.lt.s32.totalorder %s2416_s18, %s1938_s15 }
 0x344   : > { %p1936_p3 = pneg %p1935_p2 }
 0x345   : > { %1327 = vrot.lane.b32.xlu1 %v1283_v3, %s2071_s28  ;;  %1318 = vrot.lane.b32.xlu0 %v1283_v3, %s2072_s16  ;;  %s1939_s28 = scalar_lea.vmem %s1938_s15, 2048 }
 0x346   : > { %p1941_p6 = scmp.lt.s32.totalorder %s1939_s28, %s1933_s30 }
 0x348   : > { %p1942_p7 = por %p1941_p6, %p1940_p4 }
 0x349   : > { %1324 = vrot.lane.b32.xlu0 %v1283_v3, %s2073_s17 }
 0x34a   : > { %p1943_p8 = pnand %p1942_p7, %p1936_p3 }
 0x34d   : > { %1338 = vrot.lane.b32.xlu0 %v1284_v4, %s2074_s20 }
 0x393   : > { %v1334_v61 = vpop.permute.xlu1 %1333 }
 0x39f   : > { %v1290_v45 = vpop.permute.xlu1 %1289  ;;  %v1306_v10 = vpop.permute.xlu0 %1305 }
 0x3a0   : > { %v1341_v15 = vcombine.low %v1282_v8, %v1290_v45 }
 0x3a2   : > { %v1348_v22 = vrot.slane %v1341_v15, %v2197_v28 }
 0x3a3   : > { %v1296_v11 = vpop.permute.xlu1 %1295  ;;  %v1287_v60 = vpop.permute.xlu0 %1286 }
 0x3a7   : > { %v1302_v12 = vpop.permute.xlu1 %1301  ;;  %v1293_v13 = vpop.permute.xlu0 %1292 }
 0x3a8   : > { %v1349_v14 = vcombine.low %v1287_v60, %v1293_v13  ;;  %v1357_v16 = vcombine.low %v1296_v11, %v1302_v12 }
 0x3aa   : > { %v1356_v18 = vrot.slane %v1349_v14, %v2197_v28  ;;  %v1364_v24 = vrot.slane %v1357_v16, %v2197_v28 }
 0x3ab   : > { %v1308_v19 = vpop.permute.xlu1 %1307  ;;  %v1299_v20 = vpop.permute.xlu0 %1298 }
 0x3ac   : > { %v1310_v21 = vsel %vm1309_vm4, %v1306_v10, %v1308_v19  ;;  %v1373_v25 = vcombine.low %v1348_v22, %v1356_v18  ;;  %v1374_v26 = vcombine.high %v1348_v22, %v1356_v18 }
 0x3ad   : > { %v1365_v23 = vcombine.low %v1299_v20, %v1310_v21 }
 0x3ae   : > { %v1381_v17 = vrot.slane %v1373_v25, %v2199_v36  ;;  %v1388_v32 = vrot.slane %v1374_v26, %v2199_v36 }
 0x3af   : > { %v1372_v27 = vrot.slane %v1365_v23, %v2197_v28  ;;  %v1332_v29 = vpop.permute.xlu0 %1331  ;;  %v1316_v35 = vpop.permute.xlu1 %1315 }
 0x3b0   : > { %v1336_v48 = vsel %vm1335_vm10, %v1332_v29, %v1334_v61 }
 0x3b1   : > { %v1389_v30 = vcombine.low %v1364_v24, %v1372_v27  ;;  %v1390_v31 = vcombine.high %v1364_v24, %v1372_v27 }
 0x3b3   : > { %v1397_v33 = vrot.slane %v1389_v30, %v2199_v36  ;;  %v1404_v34 = vrot.slane %v1390_v31, %v2199_v36  ;;  %v1313_v37 = vpop.permute.xlu0 %1312  ;;  %v1322_v43 = vpop.permute.xlu1 %1321 }
 0x3b4   : > { %v1417_v47 = vcombine.low %v1316_v35, %v1322_v43 }
 0x3b5   : > { %v1405_v38 = vcombine.low %v1381_v17, %v1397_v33  ;;  %v1406_v39 = vcombine.high %v1381_v17, %v1397_v33  ;;  %v1407_v40 = vcombine.low %v1388_v32, %v1404_v34  ;;  %v1408_v41 = vcombine.high %v1388_v32, %v1404_v34 }
 0x3b6   : > { %v1424_v53 = vrot.slane %v1417_v47, %v2197_v28 }
 0x3b7   : > { %1477 = vst.msk [vmem:[%s2391_s19] sm:$0xff] %vm768_vm0, %v1405_v38  ;;  %1479 = vst.msk [vmem:[%s2391_s19 + $0x10] sm:$0xff] %vm768_vm0, %v1406_v39  ;;  %v1319_v42 = vpop.permute.xlu0 %1318  ;;  %v1328_v51 = vpop.permute.xlu1 %1327 }
 0x3b8   : > { %1481 = vst.msk [vmem:[%s2391_s19 + $0x20] sm:$0xff] %vm768_vm0, %v1407_v40  ;;  %1483 = vst.msk [vmem:[%s2391_s19 + $0x30] sm:$0xff] %vm768_vm0, %v1408_v41  ;;  %v1409_v44 = vcombine.low %v1313_v37, %v1319_v42 }
 0x3ba   : > { %v1416_v49 = vrot.slane %v1409_v44, %v2197_v28 }
 0x3bb   : > { %v1325_v46 = vpop.permute.xlu0 %1324 }
 0x3bc   : > { %v1425_v50 = vcombine.low %v1325_v46, %v1336_v48  ;;  %v1441_v55 = vcombine.low %v1416_v49, %v1424_v53  ;;  %v1442_v56 = vcombine.high %v1416_v49, %v1424_v53 }
 0x3be   : > { %v1432_v57 = vrot.slane %v1425_v50, %v2197_v28  ;;  %v1449_v63 = vrot.slane %v1441_v55, %v2199_v36  ;;  %v1456_v0 = vrot.slane %v1442_v56, %v2199_v36 }
 0x3bf   : > { %v1339_v52 = vpop.permute.xlu0 %1338 }
 0x3c0   : > { %v1433_v54 = vcombine.low %v1328_v51, %v1339_v52 }
 0x3c2   : > { %v1440_v58 = vrot.slane %v1433_v54, %v2197_v28 }
 0x3c4   : > { %v1457_v59 = vcombine.low %v1432_v57, %v1440_v58  ;;  %v1458_v62 = vcombine.high %v1432_v57, %v1440_v58 }
 0x3c6   : > { %v1465_v1 = vrot.slane %v1457_v59, %v2199_v36  ;;  %v1472_v2 = vrot.slane %v1458_v62, %v2199_v36 }
 0x3c8   : > { %v1473_v28 = vcombine.low %v1449_v63, %v1465_v1  ;;  %v1474_v4 = vcombine.high %v1449_v63, %v1465_v1  ;;  %v1475_v5 = vcombine.low %v1456_v0, %v1472_v2  ;;  %v1476_v7 = vcombine.high %v1456_v0, %v1472_v2 }
 0x3ca   : > { %1478 = vst.msk [vmem:[%s2391_s19 + $0x8] sm:$0xff] %vm768_vm0, %v1473_v28  ;;  %1480 = vst.msk [vmem:[%s2391_s19 + $0x18] sm:$0xff] %vm768_vm0, %v1474_v4 }
 0x3cb   : > { %1482 = vst.msk [vmem:[%s2391_s19 + $0x28] sm:$0xff] %vm768_vm0, %v1475_v5  ;;  %1484 = vst.msk [vmem:[%s2391_s19 + $0x38] sm:$0xff] %vm768_vm0, %v1476_v7 }
 0x3cc   : > { %1946 = shalt.err (!%p1943_p8)
}
 0x3cd   : > { %s1947_s16 = scalar_lea.hbm %s2414_s12, 1024  ;;  %s1951_s19 = scalar_lea.hbm %s2479_s6, 2048 }
 0x3ce   : > { %p1948_p11 = scmp.ne.s32.totalorder %s2414_s12, %s1947_s16  ;;  %p1952_p0 = scmp.lt.u32.totalorder %s2414_s12, %s2479_s6 }
 0x3cf   : > { %p1953_p1 = scmp.lt.u32.totalorder %s1951_s19, %s1947_s16  ;;  %p1955_p3 = scmp.lt.u32.totalorder %s1947_s16, %s2414_s12 }
 0x3d0   : > { %p1949_p12 = pnand %p1948_p11, %p2156_p5 }
 0x3d1   : > { %p1954_p2 = por %p1953_p1, %p1952_p0 }
 0x3d2   : > { %p1950_p13 = pneg %p1949_p12 }
 0x3d3   : > { %p1956_p4 = por %p1955_p3, %p1954_p2 }
 0x3d5   : > { %p1957_p6 = pnand %p1956_p4, %p1950_p13 }
 0x3d7   : > { %1960 = shalt.err (!%p1957_p6)
}
 0x3d8   : > { %s2076_s9 = smov 128   ;;  %s2077_s30 = smov 8  }
 0x3d9   : > { %1768 = dma.vmem_to_hbm [thread:$0]  (%p2156_p5), %s2416_s18, 1024, %s2414_s12, %s1486_s24, %s2076_s9, %s2076_s9, %s2077_s30  }
 0x3da PF: > { %s1516_s13 = sand.u32 1, %s2007_s21   ;;  %p1771_p7 = pnand %p1656_p10, %p2167_p9 }
 0x3db   : > { %s1517_s15 = scalar_lea.sflag [#allocation5], %s1516_s13 }
 0x3dc   : > { %2002 = dma.done.wait (!%p1771_p7), %s1517_s15, 1024  }
 0x3dd   : > { %2004 = vsyncadd (!%p1771_p7), %s1517_s15, 4294966272  ;;  %s19_s26 = sadd.s32 1, %s2027_s26   ;;  %s2483_s21 = smov %s2011_s22 }
 0x3de   : > { %p16_p8 = scmp.ge.s32.totalorder %s19_s26, 4   ;;  %s2484_s22 = smov %s2015_s23 }
 0x3df   : > { %s2485_s23 = smov %s2165_s10  ;;  %s2486_s24 = smov %s2023_s25 }
 0x3e0   : > { %s2487_s25 = smov %s2489_s29  ;;  %18 = sbr.rel (!%p16_p8) target bundleno = 4 (0x4), region = 212 }
 0x3e7   :  { %1522 = vsyncpa [#allocation5], 1 }
 0x3e8   :  { %1524 = vsyncpa [#allocation5 + $0x1], 1 }

</bundles_post_ra>
